<compile_context>
chip_gen: v6e
topology: v6e:2x2x1
jax: 0.10.0
libtpu: 0.0.40
codegen_flags: <defaults>
</compile_context>

<pallas_src>
import jax
import jax.numpy as jnp
from jax.experimental import pallas as pl
from jax.experimental.pallas import tpu as pltpu


# ----------------------------------------------------------------------------
# Kernel
# ----------------------------------------------------------------------------
def simple_dnn_kernel(x_ref, w1_ref, b1_ref, w2_ref, b2_ref, w3_ref, b3_ref,
                      out_ref):
    # f32 -> bf16 cast on the VPU (hidden under the DMA pipeline), then MXU dot
    # with f32 accumulation. Bias add / ReLU / softmax stay f32.
    x = x_ref[...].astype(w1_ref.dtype)

    # Hidden layer 1: Linear -> ReLU (Dropout == identity at inference).
    h = jnp.dot(x, w1_ref[...], preferred_element_type=jnp.float32)
    h = jnp.maximum(h + b1_ref[...], 0.0)

    # Hidden layer 2: Linear -> ReLU
    h = jnp.dot(h.astype(w2_ref.dtype), w2_ref[...],
                preferred_element_type=jnp.float32)
    h = jnp.maximum(h + b2_ref[...], 0.0)

    # Output layer: Linear. Output columns are padded to 128 lanes; the padded
    # bias lanes are -1e30 so exp() underflows to exactly 0 in the softmax.
    logits = jnp.dot(h.astype(w3_ref.dtype), w3_ref[...],
                     preferred_element_type=jnp.float32)
    logits = logits + b3_ref[...]

    # softmax over dim=1 (feature axis), f32 math, exact normalization
    # (the divide is free: kernel is DMA/overhead-bound, not VALU/EUP-bound).
    m = jnp.max(logits, axis=1, keepdims=True)
    e = jnp.exp(logits - m)
    denom = jnp.sum(e, axis=1, keepdims=True)
    out_ref[...] = (e / denom).astype(out_ref.dtype)


# ----------------------------------------------------------------------------
# Wrapper
# ----------------------------------------------------------------------------
def _round_up(n, m):
    return ((n + m - 1) // m) * m


def prepare_params(params, *, lane_pad=128, mxu_dtype=jnp.bfloat16):
    """One-time param prep: pad output lanes to a multiple of 128, cast weights
    to the MXU dtype. Hoisted out of the per-call forward (perf review)."""
    (w1, b1), (w2, b2), (w3, b3) = params
    out_dim = int(w3.shape[1])
    out_pad = _round_up(out_dim, lane_pad)

    w3_p = jnp.pad(w3, ((0, 0), (0, out_pad - out_dim)))
    # Padded logit lanes get bias -1e30 -> softmax probability exactly 0.
    b3_p = jnp.pad(b3, ((0, 0), (0, out_pad - out_dim)), constant_values=-1e30)

    return {
        "w1": w1.astype(mxu_dtype), "b1": b1.astype(jnp.float32),
        "w2": w2.astype(mxu_dtype), "b2": b2.astype(jnp.float32),
        "w3": w3_p.astype(mxu_dtype), "b3": b3_p.astype(jnp.float32),
        "out_dim": out_dim,
    }


def _choose_tb(B, block_batch):
    """Batch tile: multiple of 16 (8 for tiny B), >=2 grid tiles when possible
    so v7x's second TensorCore has work, capped at block_batch."""
    if B <= 16:
        return _round_up(B, 8)
    tb = min(block_batch, _round_up(B, 16))
    tb = min(tb, _round_up(pl.cdiv(B, 2), 16))   # ensure >= 2 grid steps
    return max(tb, 16)


def _vmem_bytes_estimate(TB, in_dim, h1, h2, out_pad):
    x_stream = 2 * TB * in_dim * 4        # f32 x, double-buffered
    out_stream = 2 * TB * out_pad * 2     # bf16 out, double-buffered
    inter = 2 * TB * (h1 + h2 + out_pad) * 4   # f32 temporaries (generous)
    weights = 256 * 1024
    return x_stream + out_stream + inter + weights


def simple_dnn_forward(x, prepped, *, block_batch=2048, out_dtype=jnp.bfloat16):
    """x: (B, input_dim) f32. prepped: output of prepare_params()."""
    w1, b1 = prepped["w1"], prepped["b1"]
    w2, b2 = prepped["w2"], prepped["b2"]
    w3, b3 = prepped["w3"], prepped["b3"]
    out_dim = prepped["out_dim"]

    B, in_dim = x.shape
    h1, h2 = w1.shape[1], w2.shape[1]
    out_pad = w3.shape[1]

    # Batch tiling: weights/biases VMEM-resident (constant index_map), only
    # x / out stream. TB chosen to divide B for the common small/aligned case.
    TB = _choose_tb(B, block_batch)
    B_pad = _round_up(B, TB)
    if B_pad != B:
        # rare fallback; padded rows are garbage-but-valid and sliced off below
        x = jnp.pad(x, ((0, B_pad - B), (0, 0)))
    grid = (B_pad // TB,)

    def resident(shape):
        zeros = tuple(0 for _ in shape)
        return pl.BlockSpec(shape, lambda i: zeros)

    vmem_limit = int(min(max(2 * _vmem_bytes_estimate(TB, in_dim, h1, h2, out_pad),
                             32 * 1024 * 1024),
                         40 * 1024 * 1024))

    out = pl.pallas_call(
        simple_dnn_kernel,
        out_shape=jax.ShapeDtypeStruct((B_pad, out_pad), out_dtype),
        grid=grid,
        in_specs=[
            pl.BlockSpec((TB, in_dim), lambda i: (i, 0)),   # x: streamed per tile (f32)
            resident(w1.shape), resident(b1.shape),         # weights: VMEM-resident
            resident(w2.shape), resident(b2.shape),
            resident(w3.shape), resident(b3.shape),
        ],
        out_specs=pl.BlockSpec((TB, out_pad), lambda i: (i, 0)),
        compiler_params=pltpu.CompilerParams(
            dimension_semantics=("parallel",),              # shard batch on v7x's 2 TCs
            vmem_limit_bytes=vmem_limit,                    # covers v5e's 16 MiB default
        ),
    )(x, w1, b1, w2, b2, w3, b3)

    # NOTE: slice is tiny; fuse it into the consumer's jit if this forward is
    # embedded in a larger program.
    return out[:B, :out_dim]


def init_params(key, input_dim, hidden_dims, output_dim):
    """Deterministic parameter init; weights stored as (in_dim, out_dim)."""
    dims = [input_dim] + list(hidden_dims) + [output_dim]
    params = []
    for i in range(len(dims) - 1):
        key, kw, kb = jax.random.split(key, 3)
        fan_in = dims[i]
        bound = 1.0 / jnp.sqrt(fan_in)
        w = jax.random.uniform(kw, (dims[i], dims[i + 1]), jnp.float32,
                               -bound, bound)
        # biases kept 2-D (1, out) for clean lane-wise broadcast in the kernel
        b = jax.random.uniform(kb, (1, dims[i + 1]), jnp.float32, -bound, bound)
        params.append((w, b))
    return params


if __name__ == "__main__":
    # SimpleDNN(input_dim=32, output_dim=16, hidden_layers=([64, 32], [0.1, 0.2]))
    batch = 8
    input_dim = 32
    hidden_dims = (64, 32)
    output_dim = 16

    key = jax.random.PRNGKey(0)
    key, kx = jax.random.split(key)
    x = jax.random.normal(kx, (batch, input_dim), jnp.float32)

    params = init_params(key, input_dim, hidden_dims, output_dim)
    prepped = prepare_params(params)          # one-time weight pad + bf16 cast

    out = simple_dnn_forward(x, prepped)
    out = jax.block_until_ready(out)

    # sanity: softmax rows sum to 1 (bf16 output -> ~2e-3 relative error budget)
    row_sums = jnp.sum(out.astype(jnp.float32), axis=1)
    assert out.shape == (batch, output_dim)
    assert bool(jnp.all(jnp.abs(row_sums - 1.0) < 1e-2))
    assert bool(jnp.all(out.astype(jnp.float32) >= 0.0))
    print("KERNEL_OK")
</pallas_src>

<mosaic_0001>
module attributes {stable_mosaic.version = 11 : i64} {
  func.func @simple_dnn_kernel(%arg0: i32, %arg1: memref<8x32xf32, #tpu.memory_space<vmem>>, %arg2: memref<32x64xbf16, #tpu.memory_space<vmem>>, %arg3: memref<1x64xf32, #tpu.memory_space<vmem>>, %arg4: memref<64x32xbf16, #tpu.memory_space<vmem>>, %arg5: memref<1x32xf32, #tpu.memory_space<vmem>>, %arg6: memref<32x128xbf16, #tpu.memory_space<vmem>>, %arg7: memref<1x128xf32, #tpu.memory_space<vmem>>, %arg8: memref<8x128xbf16, #tpu.memory_space<vmem>>) attributes {dimension_semantics = [#tpu.dimension_semantics<parallel>], iteration_bounds = array<i64: 1>, scalar_prefetch = 0 : i64, scratch_operands = 0 : i64, tpu.core_type = #tpu.core_type<tc>, window_params = [{transform_indices = @transform_0, window_bounds = array<i64: 8, 32>}, {pipeline_mode = #tpu.pipeline_mode<synchronous>, transform_indices = @transform_1, window_bounds = array<i64: 32, 64>}, {pipeline_mode = #tpu.pipeline_mode<synchronous>, transform_indices = @transform_2, window_bounds = array<i64: 1, 64>}, {pipeline_mode = #tpu.pipeline_mode<synchronous>, transform_indices = @transform_3, window_bounds = array<i64: 64, 32>}, {pipeline_mode = #tpu.pipeline_mode<synchronous>, transform_indices = @transform_4, window_bounds = array<i64: 1, 32>}, {pipeline_mode = #tpu.pipeline_mode<synchronous>, transform_indices = @transform_5, window_bounds = array<i64: 32, 128>}, {pipeline_mode = #tpu.pipeline_mode<synchronous>, transform_indices = @transform_6, window_bounds = array<i64: 1, 128>}, {transform_indices = @transform_7, window_bounds = array<i64: 8, 128>}]} {
    %c0 = arith.constant 0 : index
    %c0_0 = arith.constant 0 : index
    %0 = vector.load %arg1[%c0, %c0_0] : memref<8x32xf32, #tpu.memory_space<vmem>>, vector<8x32xf32>
    %1 = arith.truncf %0 : vector<8x32xf32> to vector<8x32xbf16>
    %c0_1 = arith.constant 0 : index
    %c0_2 = arith.constant 0 : index
    %2 = vector.load %arg2[%c0_1, %c0_2] : memref<32x64xbf16, #tpu.memory_space<vmem>>, vector<32x64xbf16>
    %cst = arith.constant dense<0.000000e+00> : vector<8x64xf32>
    %3 = tpu.matmul %1, %2, %cst {dimension_numbers = #tpu.dot_dimension_numbers<[1], [0], [0], [1], [0, 0, 1, 1], [], []>} : vector<8x32xbf16>, vector<32x64xbf16>, vector<8x64xf32> -> vector<8x64xf32>
    %c0_3 = arith.constant 0 : index
    %c0_4 = arith.constant 0 : index
    %4 = vector.load %arg3[%c0_3, %c0_4] : memref<1x64xf32, #tpu.memory_space<vmem>>, vector<1x64xf32>
    %5 = vector.broadcast %4 : vector<1x64xf32> to vector<8x64xf32>
    %6 = arith.addf %3, %5 : vector<8x64xf32>
    %cst_5 = arith.constant 0.000000e+00 : f32
    %7 = vector.broadcast %cst_5 : f32 to vector<8x64xf32>
    %8 = arith.maximumf %6, %7 : vector<8x64xf32>
    %9 = arith.truncf %8 : vector<8x64xf32> to vector<8x64xbf16>
    %c0_6 = arith.constant 0 : index
    %c0_7 = arith.constant 0 : index
    %10 = vector.load %arg4[%c0_6, %c0_7] : memref<64x32xbf16, #tpu.memory_space<vmem>>, vector<64x32xbf16>
    %cst_8 = arith.constant dense<0.000000e+00> : vector<8x32xf32>
    %11 = tpu.matmul %9, %10, %cst_8 {dimension_numbers = #tpu.dot_dimension_numbers<[1], [0], [0], [1], [0, 0, 1, 1], [], []>} : vector<8x64xbf16>, vector<64x32xbf16>, vector<8x32xf32> -> vector<8x32xf32>
    %c0_9 = arith.constant 0 : index
    %c0_10 = arith.constant 0 : index
    %12 = vector.load %arg5[%c0_9, %c0_10] : memref<1x32xf32, #tpu.memory_space<vmem>>, vector<1x32xf32>
    %13 = vector.broadcast %12 : vector<1x32xf32> to vector<8x32xf32>
    %14 = arith.addf %11, %13 : vector<8x32xf32>
    %cst_11 = arith.constant 0.000000e+00 : f32
    %15 = vector.broadcast %cst_11 : f32 to vector<8x32xf32>
    %16 = arith.maximumf %14, %15 : vector<8x32xf32>
    %17 = arith.truncf %16 : vector<8x32xf32> to vector<8x32xbf16>
    %c0_12 = arith.constant 0 : index
    %c0_13 = arith.constant 0 : index
    %18 = vector.load %arg6[%c0_12, %c0_13] : memref<32x128xbf16, #tpu.memory_space<vmem>>, vector<32x128xbf16>
    %cst_14 = arith.constant dense<0.000000e+00> : vector<8x128xf32>
    %19 = tpu.matmul %17, %18, %cst_14 {dimension_numbers = #tpu.dot_dimension_numbers<[1], [0], [0], [1], [0, 0, 1, 1], [], []>} : vector<8x32xbf16>, vector<32x128xbf16>, vector<8x128xf32> -> vector<8x128xf32>
    %c0_15 = arith.constant 0 : index
    %c0_16 = arith.constant 0 : index
    %20 = vector.load %arg7[%c0_15, %c0_16] : memref<1x128xf32, #tpu.memory_space<vmem>>, vector<1x128xf32>
    %21 = vector.broadcast %20 : vector<1x128xf32> to vector<8x128xf32>
    %22 = arith.addf %19, %21 : vector<8x128xf32>
    %cst_17 = arith.constant dense<0xFF800000> : vector<8xf32>
    %23 = vector.multi_reduction <maximumf>, %22, %cst_17 [1] : vector<8x128xf32> to vector<8xf32>
    %24 = vector.shape_cast %23 : vector<8xf32> to vector<8x1xf32>
    %25 = vector.broadcast %24 : vector<8x1xf32> to vector<8x128xf32>
    %26 = arith.subf %22, %25 : vector<8x128xf32>
    %27 = math.exp %26 : vector<8x128xf32>
    %cst_18 = arith.constant dense<0.000000e+00> : vector<8xf32>
    %28 = vector.multi_reduction <add>, %27, %cst_18 [1] : vector<8x128xf32> to vector<8xf32>
    %29 = vector.shape_cast %28 : vector<8xf32> to vector<8x1xf32>
    %30 = vector.broadcast %29 : vector<8x1xf32> to vector<8x128xf32>
    %31 = arith.divf %27, %30 : vector<8x128xf32>
    %32 = arith.truncf %31 : vector<8x128xf32> to vector<8x128xbf16>
    %c0_19 = arith.constant 0 : index
    %c0_20 = arith.constant 0 : index
    %33 = vector.load %arg8[%c0_19, %c0_20] : memref<8x128xbf16, #tpu.memory_space<vmem>>, vector<8x128xbf16>
    tpu.vector_store %arg8[%c0_19, %c0_20], %32 {strides = array<i32>} : memref<8x128xbf16, #tpu.memory_space<vmem>>, vector<8x128xbf16>,
    return
  }
  func.func @transform_0(%arg0: i32) -> (i32, i32) {
    %c0_i32 = arith.constant 0 : i32
    %c0_i32_0 = arith.constant 0 : i32
    return %arg0, %c0_i32 : i32, i32
  }
  func.func @transform_1(%arg0: i32) -> (i32, i32) {
    %c0_i32 = arith.constant 0 : i32
    %c0_i32_0 = arith.constant 0 : i32
    %c0_i32_1 = arith.constant 0 : i32
    return %c0_i32, %c0_i32_0 : i32, i32
  }
  func.func @transform_2(%arg0: i32) -> (i32, i32) {
    %c0_i32 = arith.constant 0 : i32
    %c0_i32_0 = arith.constant 0 : i32
    %c0_i32_1 = arith.constant 0 : i32
    return %c0_i32, %c0_i32_0 : i32, i32
  }
  func.func @transform_3(%arg0: i32) -> (i32, i32) {
    %c0_i32 = arith.constant 0 : i32
    %c0_i32_0 = arith.constant 0 : i32
    %c0_i32_1 = arith.constant 0 : i32
    return %c0_i32, %c0_i32_0 : i32, i32
  }
  func.func @transform_4(%arg0: i32) -> (i32, i32) {
    %c0_i32 = arith.constant 0 : i32
    %c0_i32_0 = arith.constant 0 : i32
    %c0_i32_1 = arith.constant 0 : i32
    return %c0_i32, %c0_i32_0 : i32, i32
  }
  func.func @transform_5(%arg0: i32) -> (i32, i32) {
    %c0_i32 = arith.constant 0 : i32
    %c0_i32_0 = arith.constant 0 : i32
    %c0_i32_1 = arith.constant 0 : i32
    return %c0_i32, %c0_i32_0 : i32, i32
  }
  func.func @transform_6(%arg0: i32) -> (i32, i32) {
    %c0_i32 = arith.constant 0 : i32
    %c0_i32_0 = arith.constant 0 : i32
    %c0_i32_1 = arith.constant 0 : i32
    return %c0_i32, %c0_i32_0 : i32, i32
  }
  func.func @transform_7(%arg0: i32) -> (i32, i32) {
    %c0_i32 = arith.constant 0 : i32
    %c0_i32_0 = arith.constant 0 : i32
    return %arg0, %c0_i32 : i32, i32
  }
}

</mosaic_0001>

<bundles_post_ra>
// kernel: tpu_custom_call.1
= control target key start
LH: loop header
LB: loop body
LE: loop exit
PB: predicated region body
PF: predicated region fallthrough
CT: control target
= control target key end

     0   :  { %v365_v1 = vmov 0.0   ;;  %vm366_vm0 = vmmov 0   ;;  %vm53_vm1 = vcmask 261120   ;;  %s452_s0 = inlined_call_operand.vmem [shape: f32[8,32], index: 0, kind: input, shape index: {}]   ;;  %s453_s1 = inlined_call_operand.vmem [shape: bf16[32,64], index: 1, kind: input, shape index: {}]   ;;  %s454_s2 = inlined_call_operand.vmem [shape: f32[1,64], index: 2, kind: input, shape index: {}]   ;;  %s455_s3 = inlined_call_operand.vmem [shape: bf16[64,32], index: 3, kind: input, shape index: {}]   ;;  %s456_s4 = inlined_call_operand.vmem [shape: f32[1,32], index: 4, kind: input, shape index: {}]   ;;  %s457_s5 = inlined_call_operand.vmem [shape: bf16[32,128], index: 5, kind: input, shape index: {}]   ;;  %s458_s6 = inlined_call_operand.vmem [shape: f32[1,128], index: 6, kind: input, shape index: {}]   ;;  %s459_s7 = inlined_call_operand.hbm [shape: bf16[8,128], index: 7, kind: output, shape index: {}]  }
   0x1   :  { %v331_v0 = vld [vmem:[%s453_s1 + $0x8] sm:$0xff]   ;;  %300 = vmatprep.subr.bf16.mxu0 %v365_v1  ;;  %v332_v2 = vld [vmem:[%s453_s1] sm:$0xff]   ;;  %308 = vmatprep.subr.bf16.mxu1 %v365_v1  ;;  %v333_v4 = vld [vmem:[%s455_s3 + $0x18] sm:$0xff]  }
   0x2   :  { %301 = vmatpush3.bf16.msra.mxu0 %v331_v0  ;;  %304 = vmatprep.mubr.msk.bf16.mxu0 %vm366_vm0, %v365_v1  ;;  %v28_v3 = vld [vmem:[%s452_s0] sm:$0xff]  ;;  %v334_v5 = vld [vmem:[%s455_s3 + $0x10] sm:$0xff]  }
   0x3   :  { %302 = vmatprep.subr.bf16.mxu0 %v365_v1  ;;  %316 = vmatprep.mubr.msk.bf16.mxu1 %vm366_vm0, %v365_v1  ;;  %v29_v6 = vpack.c.bf16 %v28_v3, %v28_v3 }
   0x4   :  { %309 = vmatpush3.bf16.msra.mxu1 %v333_v4 }
   0x5   :  { %310 = vmatprep.subr.bf16.mxu1 %v365_v1 }
   0x6   :  { %303 = vmatpush3.bf16.msra.mxu0 %v332_v2 }
   0x7   :  { %320 = vmatprep.subr.bf16.mxu0 %v365_v1 }
   0x8   :  { %12 = vsyncpa [#allocation3], 0  ;;  %311 = vmatpush3.bf16.msra.mxu1 %v334_v5  ;;  %v335_v7 = vld [vmem:[%s455_s3 + $0x8] sm:$0xff]   ;;  %v336_v8 = vld [vmem:[%s455_s3] sm:$0xff]   ;;  %vm138_vm2 = vcmask 523264  }
   0x9   :  { %305 = vmatmul.mubr.msk.bf16.vlgmr.msra.gmra.mxu0 %vm53_vm1, %v29_v6  ;;  %312 = vmatprep.subr.bf16.mxu1 %v365_v1  ;;  %v337_v9 = vld [vmem:[%s457_s5 + $0x8] sm:$0xff]   ;;  %v275_v10 = vld [vmem:[%s454_s2] ss:$0 sm:$0xff] }
   0xa   :  { %324 = vmatprep.mubr.msk.bf16.mxu0 %vm366_vm0, %v365_v1  ;;  %321 = vmatpush3.bf16.msra.mxu0 %v337_v9  ;;  %v338_v18 = vld [vmem:[%s457_s5] sm:$0xff]  }
   0xb   :  { %322 = vmatprep.subr.bf16.mxu0 %v365_v1  ;;  %v279_v19 = vld [vmem:[%s456_s4] ss:$0 sm:$0xff]  ;;  %s367_s4 = smov [#allocation2]  }
   0xc   :  { %313 = vmatpush3.bf16.msra.mxu1 %v335_v7  ;;  %v285_v27 = vld [vmem:[%s458_s6] ss:$0 sm:$0xff]  ;;  %s267_s5 = sshll.u32 %s367_s4, 4  ;;  %s268_s5 = int_to_ptr.vmem [resolvable:$true] %s267_s5 }
   0xd   :  { %314 = vmatprep.subr.bf16.mxu1 %v365_v1  ;;  %s343_s6 = scalar_lea.vmem %s268_s5, 64  ;;  %p348_p1 = scmp.lt.s32.totalorder %s268_s5, %s268_s5 }
   0xe   :  { %323 = vmatpush3.bf16.msra.mxu0 %v338_v18  ;;  %p344_p0 = scmp.ne.s32.totalorder %s268_s5, %s343_s6  ;;  %p349_p2 = scmp.lt.s32.totalorder %s343_s6, %s343_s6 }
  0x10   :  { %315 = vmatpush3.bf16.msra.mxu1 %v336_v8  ;;  %p350_p3 = por %p349_p2, %p348_p1 }
  0x12   :  { %p351_p4 = pnand %p350_p3, %p344_p0 }
  0xc9   :  { %v91_v11 = vpop.f32.mrf.mxu0 }
  0xca   :  { %v92_v12 = vadd.f32 %v275_v10, %v91_v11 }
  0xcb   :  { %v306_v13 = vpop.f32.mrf.mxu0 }
  0xcc   :  { %v97_v14 = vmax.f32 %v92_v12, 0.0 }
  0xcd   :  { %v94_v15 = vpop.f32.mrf.mxu0 }
  0xce   :  { %v98_v16 = vpack.c.bf16 %v97_v14, %v97_v14 }
  0xcf   :  { %v307_v17 = vpop.f32.mrf.mxu0 }
  0xd0   :  { %317 = vmatmul.mubr.msk.bf16.vlgmr.msra.gmra.mxu1 %vm138_vm2, %v98_v16 }
 0x190   :  { %v176_v20 = vpop.f32.mrf.mxu1 }
 0x191   :  { %v177_v21 = vadd.f32 %v279_v19, %v176_v20 }
 0x192   :  { %v318_v22 = vpop.f32.mrf.mxu1 }
 0x193   :  { %v182_v23 = vmax.f32 %v177_v21, 0.0 }
 0x194   :  { %v179_v24 = vpop.f32.mrf.mxu1 }
 0x195   :  { %v183_v25 = vpack.c.bf16 %v182_v23, %v182_v23 }
 0x196   :  { %v319_v26 = vpop.f32.mrf.mxu1 }
 0x197   :  { %325 = vmatmul.mubr.msk.bf16.vlgmr.msra.gmra.mxu0 %vm53_vm1, %v183_v25 }
 0x257   :  { %v244_v28 = vpop.f32.mrf.mxu0 }
 0x258   :  { %v245_v29 = vadd.f32 %v285_v27, %v244_v28 }
 0x259   :  { %v326_v30 = vpop.f32.mrf.mxu0 }
 0x25a   :  { %250 = vmax.xlane.f32.xlu0 %v245_v29 }
 0x25b   :  { %v247_v31 = vpop.f32.mrf.mxu0 }
 0x25d   :  { %v327_v32 = vpop.f32.mrf.mxu0 }
 0x2e3   :  { %v251_v33 = vpop.xlane.xlu0 %250 }
 0x2e4   :  { %v252_v34 = vsub.f32 %v245_v29, %v251_v33 }
 0x2e6   :  { %v253_v35 = vmul.f32 1.442695, %v252_v34 }
 0x2e8   :  { %339 = vpow2.f32 %v253_v35 }
 0x2f5   :  { %v340_v36 = vpop.eup %339 }
 0x2f6   :  { %255 = vadd.xlane.f32.xlu0 %v340_v36 }
 0x37f   :  { %v256_v37 = vpop.xlane.xlu0 %255 }
 0x380   :  { %341 = vrcp.f32 %v256_v37 }
 0x38d   :  { %v342_v38 = vpop.eup %341 }
 0x38e   :  { %v258_v39 = vmul.f32 %v342_v38, %v340_v36 }
 0x390   :  { %v259_v40 = vpack.c.bf16 %v258_v39, %v258_v39 }
 0x392   :  { %260 = vst [vmem:[#allocation2] sm:$0xf] %v259_v40 }
 0x393   :  { %354 = shalt.err (!%p351_p4)
}
 0x394   :  { %270 = dma.vmem_to_hbm [thread:$0]  %s268_s5, 64, %s459_s7, [#allocation3]  }
 0x395   :  { %363 = dma.done.wait [#allocation3], 64  }
 0x396   :  { %364 = vsyncadd [#allocation3], 4294967232 }
 0x397   :  { %274 = vsyncpa [#allocation3], 1 }

</bundles_post_ra>
